<compile_context>
chip_gen: v5e
topology: v5e:2x2
jax: 0.10.0
libtpu: 0.0.40
codegen_flags: <defaults>
</compile_context>

<pallas_src>
import jax
import jax.numpy as jnp
import numpy as np
from jax.experimental import pallas as pl
from jax.experimental.pallas import tpu as pltpu


def bow_kernel(idx_ref, len_ref, emb_ref, out_ref, acc_ref):
    """Grid = (batch tiles, vocab tiles); the vocab axis is the reduction axis.

    idx_ref: (bm, L)  int32   token ids for this batch tile (resident over V)
    len_ref: (bm, 1)  float32 bag lengths                   (resident over V)
    emb_ref: (bv, Hp) bf16/f32 embedding-table tile         (streamed over V)
    out_ref: (bm, Hp) float32 output tile
    acc_ref: (bm, Hp) float32 accumulator scratch (persists across V steps)
    """
    bm, L = idx_ref.shape
    bv, _ = emb_ref.shape
    j = pl.program_id(1)

    @pl.when(j == 0)
    def _init():
        acc_ref[...] = jnp.zeros_like(acc_ref)

    # Tile-local token ids; iota hoisted out of the L loop (built once/step).
    idx = idx_ref[...] - j * bv                                     # (bm, L)
    vid = jax.lax.broadcasted_iota(jnp.int32, (bm, bv), 1)          # (bm, bv)

    # Histogram of this batch tile's tokens over this vocab tile.  L is static
    # and small, so this Python loop is fully unrolled at trace time
    # (equivalent to lax.fori_loop(..., unroll=True)); peak live data is
    # (bm, bv) -- the (bm, L, bv) one-hot is never built.
    counts = jnp.zeros((bm, bv), jnp.float32)
    for l in range(L):
        col = idx[:, l:l + 1]                                       # (bm, 1)
        counts = counts + (col == vid).astype(jnp.float32)

    # MXU matmul with f32 accumulation.  counts <= L are exact in bf16 for
    # L <= 256 (the wrapper falls back to an f32 dot otherwise).
    acc_ref[...] += jnp.dot(counts.astype(emb_ref.dtype), emb_ref[...],
                            preferred_element_type=jnp.float32)

    @pl.when(j == pl.num_programs(1) - 1)
    def _finalize():
        inv_len = pl.reciprocal(len_ref[...], approx=True)          # EUP slot
        out_ref[...] = (acc_ref[...] * inv_len).astype(out_ref.dtype)


def _round_up(x, m):
    return (x + m - 1) // m * m


def bag_of_words(x, length, emb, *, bm=None, bv=None, dot_in_bf16=True):
    """x: (B, L) int, length: (B,), emb: (V, H) f32  ->  (B, H) f32."""
    B, L = x.shape
    V, H = emb.shape

    if dot_in_bf16 and L > 256:
        dot_in_bf16 = False  # bf16 counts are only exact up to 256

    # Lane-dense / MXU-friendly padded shapes and tiles.
    H_pad = _round_up(H, 128)
    if bm is None:
        bm = min(_round_up(B, 8), 128)     # batch rows per step (MXU M dim)
    bm = _round_up(bm, 8)
    B_pad = _round_up(B, bm)
    if bv is None:
        bv = min(_round_up(V, 128), 512)   # vocab rows per step (MXU K dim)
    bv = _round_up(bv, 8)
    V_pad = _round_up(V, bv)

    emb_dtype = jnp.bfloat16 if dot_in_bf16 else jnp.float32

    # Padded operands.  Padded batch rows index vocab row 0 with length 1 and
    # are sliced away; padded vocab rows / hidden columns are zero.
    x_p = jnp.zeros((B_pad, L), jnp.int32).at[:B].set(x.astype(jnp.int32))
    len_p = jnp.ones((B_pad, 1), jnp.float32)
    len_p = len_p.at[:B, 0].set(length.astype(jnp.float32))
    emb_p = jnp.zeros((V_pad, H_pad), emb_dtype).at[:V, :H].set(
        emb.astype(emb_dtype))

    grid = (B_pad // bm, V_pad // bv)

    # VMEM budget: double-buffered operands + accumulator + live counts.
    # NOTE(v7x): only 64 MiB VMEM -- pick a smaller bv there so the
    # double-buffered emb tile (2 * bv * H_pad * itemsize) stays well inside
    # the scoped limit.
    itemsize = 2 if dot_in_bf16 else 4
    need = (2 * (bm * L * 4 + bm * 4 + bv * H_pad * itemsize + bm * H_pad * 4)
            + bm * H_pad * 4 + bm * bv * 4)
    vmem_limit = int(min(max(2 * need, 8 << 20), 32 << 20))

    out = pl.pallas_call(
        bow_kernel,
        out_shape=jax.ShapeDtypeStruct((B_pad, H_pad), jnp.float32),
        grid_spec=pltpu.PrefetchScalarGridSpec(
            num_scalar_prefetch=0,
            grid=grid,
            in_specs=[
                pl.BlockSpec((bm, L), lambda i, j: (i, 0)),        # token ids
                pl.BlockSpec((bm, 1), lambda i, j: (i, 0)),        # lengths
                pl.BlockSpec((bv, H_pad), lambda i, j: (j, 0)),    # emb tile
            ],
            out_specs=pl.BlockSpec((bm, H_pad), lambda i, j: (i, 0)),
            scratch_shapes=[pltpu.VMEM((bm, H_pad), jnp.float32)],
        ),
        compiler_params=pltpu.CompilerParams(
            dimension_semantics=("parallel", "arbitrary"),
            vmem_limit_bytes=vmem_limit,
        ),
    )(x_p, len_p, emb_p)

    return out[:B, :H]


def xavier_uniform(key, shape):
    fan_in, fan_out = shape
    bound = float(np.sqrt(6.0 / (fan_in + fan_out)))
    return jax.random.uniform(key, shape, jnp.float32, -bound, bound)


if __name__ == "__main__":
    # Small deterministic shapes consistent with the module; large enough to
    # exercise the 2x4 grid (2 batch tiles x 4 vocab-reduction tiles).
    B, L, V, H = 16, 8, 512, 32
    PAD_IDX = 0  # vocab '<pad>'

    key = jax.random.PRNGKey(0)
    k_emb, k_idx, k_len = jax.random.split(key, 3)

    # Deterministic parameter init (nn.Embedding(len(vocab), H), xavier).
    # Zero the padding row to mirror padding_idx semantics of the module.
    emb = xavier_uniform(k_emb, (V, H))
    emb = emb.at[PAD_IDX].set(0.0)

    # Token ids in [1, V), padded with PAD_IDX at the tail of each row.
    lengths = jax.random.randint(k_len, (B,), 1, L + 1, dtype=jnp.int32)
    ids = jax.random.randint(k_idx, (B, L), 1, V, dtype=jnp.int32)
    pos = jnp.arange(L)[None, :]
    x = jnp.where(pos < lengths[:, None], ids, PAD_IDX)

    out = bag_of_words(x, lengths, emb, bm=8, bv=128)
    out = jax.block_until_ready(out)

    # Reference matching the kernel's bf16-at-the-MXU precision; tolerance
    # also covers the approximate (EUP) reciprocal and MXU accumulation order.
    emb_bf = emb.astype(jnp.bfloat16).astype(jnp.float32)
    ref = emb_bf[x].sum(axis=1) / lengths.astype(jnp.float32)[:, None]
    np.testing.assert_allclose(np.asarray(out), np.asarray(ref),
                               rtol=1e-2, atol=1e-4)

    print("KERNEL_OK")
</pallas_src>

<mosaic_0001>
module attributes {stable_mosaic.version = 11 : i64} {
  func.func @bow_kernel(%arg0: i32, %arg1: i32, %arg2: memref<8x8xi32, #tpu.memory_space<vmem>>, %arg3: memref<8x1xf32, #tpu.memory_space<vmem>>, %arg4: memref<128x128xbf16, #tpu.memory_space<vmem>>, %arg5: memref<8x128xf32, #tpu.memory_space<vmem>>, %arg6: memref<8x128xf32, #tpu.memory_space<vmem>>) attributes {dimension_semantics = [#tpu.dimension_semantics<parallel>, #tpu.dimension_semantics<arbitrary>], iteration_bounds = array<i64: 2, 4>, scalar_prefetch = 0 : i64, scratch_operands = 1 : i64, tpu.core_type = #tpu.core_type<tc>, window_params = [{transform_indices = @transform_0, window_bounds = array<i64: 8, 8>}, {transform_indices = @transform_1, window_bounds = array<i64: 8, 1>}, {transform_indices = @transform_2, window_bounds = array<i64: 128, 128>}, {transform_indices = @transform_3, window_bounds = array<i64: 8, 128>}]} {
    %c0_i32 = arith.constant 0 : i32
    %0 = arith.cmpi eq, %arg1, %c0_i32 : i32
    %1 = arith.extui %0 : i1 to i32
    %c0_i32_0 = arith.constant 0 : i32
    %2 = arith.cmpi ne, %1, %c0_i32_0 : i32
    scf.if %2 {
      %cst_10 = arith.constant 0.000000e+00 : f32
      %66 = vector.broadcast %cst_10 : f32 to vector<8x128xf32>
      %c0_11 = arith.constant 0 : index
      %c0_12 = arith.constant 0 : index
      %67 = vector.load %arg6[%c0_11, %c0_12] : memref<8x128xf32, #tpu.memory_space<vmem>>, vector<8x128xf32>
      tpu.vector_store %arg6[%c0_11, %c0_12], %66 {strides = array<i32>} : memref<8x128xf32, #tpu.memory_space<vmem>>, vector<8x128xf32>,
    } else {
    }
    %c0 = arith.constant 0 : index
    %c0_1 = arith.constant 0 : index
    %3 = vector.load %arg2[%c0, %c0_1] : memref<8x8xi32, #tpu.memory_space<vmem>>, vector<8x8xi32>
    %c128_i32 = arith.constant 128 : i32
    %4 = arith.muli %arg1, %c128_i32 : i32
    %5 = vector.broadcast %4 : i32 to vector<8x8xi32>
    %6 = arith.subi %3, %5 : vector<8x8xi32>
    %7 = tpu.iota {dimensions = array<i32: 1>} : vector<8x128xi32>
    %cst = arith.constant 0.000000e+00 : f32
    %8 = vector.broadcast %cst : f32 to vector<8x128xf32>
    %9 = vector.extract_strided_slice %6 {offsets = [0, 0], sizes = [8, 1], strides = [1, 1]} : vector<8x8xi32> to vector<8x1xi32>
    %10 = vector.broadcast %9 : vector<8x1xi32> to vector<8x128xi32>
    %11 = arith.cmpi eq, %10, %7 : vector<8x128xi32>
    %12 = arith.extui %11 : vector<8x128xi1> to vector<8x128xi32>
    %13 = arith.sitofp %12 : vector<8x128xi32> to vector<8x128xf32>
    %14 = arith.addf %8, %13 : vector<8x128xf32>
    %15 = vector.extract_strided_slice %6 {offsets = [0, 1], sizes = [8, 1], strides = [1, 1]} : vector<8x8xi32> to vector<8x1xi32>
    %16 = vector.broadcast %15 : vector<8x1xi32> to vector<8x128xi32>
    %17 = arith.cmpi eq, %16, %7 : vector<8x128xi32>
    %18 = arith.extui %17 : vector<8x128xi1> to vector<8x128xi32>
    %19 = arith.sitofp %18 : vector<8x128xi32> to vector<8x128xf32>
    %20 = arith.addf %14, %19 : vector<8x128xf32>
    %21 = vector.extract_strided_slice %6 {offsets = [0, 2], sizes = [8, 1], strides = [1, 1]} : vector<8x8xi32> to vector<8x1xi32>
    %22 = vector.broadcast %21 : vector<8x1xi32> to vector<8x128xi32>
    %23 = arith.cmpi eq, %22, %7 : vector<8x128xi32>
    %24 = arith.extui %23 : vector<8x128xi1> to vector<8x128xi32>
    %25 = arith.sitofp %24 : vector<8x128xi32> to vector<8x128xf32>
    %26 = arith.addf %20, %25 : vector<8x128xf32>
    %27 = vector.extract_strided_slice %6 {offsets = [0, 3], sizes = [8, 1], strides = [1, 1]} : vector<8x8xi32> to vector<8x1xi32>
    %28 = vector.broadcast %27 : vector<8x1xi32> to vector<8x128xi32>
    %29 = arith.cmpi eq, %28, %7 : vector<8x128xi32>
    %30 = arith.extui %29 : vector<8x128xi1> to vector<8x128xi32>
    %31 = arith.sitofp %30 : vector<8x128xi32> to vector<8x128xf32>
    %32 = arith.addf %26, %31 : vector<8x128xf32>
    %33 = vector.extract_strided_slice %6 {offsets = [0, 4], sizes = [8, 1], strides = [1, 1]} : vector<8x8xi32> to vector<8x1xi32>
    %34 = vector.broadcast %33 : vector<8x1xi32> to vector<8x128xi32>
    %35 = arith.cmpi eq, %34, %7 : vector<8x128xi32>
    %36 = arith.extui %35 : vector<8x128xi1> to vector<8x128xi32>
    %37 = arith.sitofp %36 : vector<8x128xi32> to vector<8x128xf32>
    %38 = arith.addf %32, %37 : vector<8x128xf32>
    %39 = vector.extract_strided_slice %6 {offsets = [0, 5], sizes = [8, 1], strides = [1, 1]} : vector<8x8xi32> to vector<8x1xi32>
    %40 = vector.broadcast %39 : vector<8x1xi32> to vector<8x128xi32>
    %41 = arith.cmpi eq, %40, %7 : vector<8x128xi32>
    %42 = arith.extui %41 : vector<8x128xi1> to vector<8x128xi32>
    %43 = arith.sitofp %42 : vector<8x128xi32> to vector<8x128xf32>
    %44 = arith.addf %38, %43 : vector<8x128xf32>
    %45 = vector.extract_strided_slice %6 {offsets = [0, 6], sizes = [8, 1], strides = [1, 1]} : vector<8x8xi32> to vector<8x1xi32>
    %46 = vector.broadcast %45 : vector<8x1xi32> to vector<8x128xi32>
    %47 = arith.cmpi eq, %46, %7 : vector<8x128xi32>
    %48 = arith.extui %47 : vector<8x128xi1> to vector<8x128xi32>
    %49 = arith.sitofp %48 : vector<8x128xi32> to vector<8x128xf32>
    %50 = arith.addf %44, %49 : vector<8x128xf32>
    %51 = vector.extract_strided_slice %6 {offsets = [0, 7], sizes = [8, 1], strides = [1, 1]} : vector<8x8xi32> to vector<8x1xi32>
    %52 = vector.broadcast %51 : vector<8x1xi32> to vector<8x128xi32>
    %53 = arith.cmpi eq, %52, %7 : vector<8x128xi32>
    %54 = arith.extui %53 : vector<8x128xi1> to vector<8x128xi32>
    %55 = arith.sitofp %54 : vector<8x128xi32> to vector<8x128xf32>
    %56 = arith.addf %50, %55 : vector<8x128xf32>
    %c0_2 = arith.constant 0 : index
    %c0_3 = arith.constant 0 : index
    %57 = vector.load %arg6[%c0_2, %c0_3] : memref<8x128xf32, #tpu.memory_space<vmem>>, vector<8x128xf32>
    %58 = arith.truncf %56 : vector<8x128xf32> to vector<8x128xbf16>
    %c0_4 = arith.constant 0 : index
    %c0_5 = arith.constant 0 : index
    %59 = vector.load %arg4[%c0_4, %c0_5] : memref<128x128xbf16, #tpu.memory_space<vmem>>, vector<128x128xbf16>
    %cst_6 = arith.constant dense<0.000000e+00> : vector<8x128xf32>
    %60 = tpu.matmul %58, %59, %cst_6 {dimension_numbers = #tpu.dot_dimension_numbers<[1], [0], [0], [1], [0, 0, 1, 1], [], []>} : vector<8x128xbf16>, vector<128x128xbf16>, vector<8x128xf32> -> vector<8x128xf32>
    %61 = arith.addf %57, %60 : vector<8x128xf32>
    %c0_7 = arith.constant 0 : index
    %c0_8 = arith.constant 0 : index
    %62 = vector.load %arg6[%c0_7, %c0_8] : memref<8x128xf32, #tpu.memory_space<vmem>>, vector<8x128xf32>
    tpu.vector_store %arg6[%c0_7, %c0_8], %61 {strides = array<i32>} : memref<8x128xf32, #tpu.memory_space<vmem>>, vector<8x128xf32>,
    %c3_i32 = arith.constant 3 : i32
    %63 = arith.cmpi eq, %arg1, %c3_i32 : i32
    %64 = arith.extui %63 : i1 to i32
    %c0_i32_9 = arith.constant 0 : i32
    %65 = arith.cmpi ne, %64, %c0_i32_9 : i32
    scf.if %65 {
      %c0_10 = arith.constant 0 : index
      %c0_11 = arith.constant 0 : index
      %66 = vector.load %arg3[%c0_10, %c0_11] : memref<8x1xf32, #tpu.memory_space<vmem>>, vector<8x1xf32>
      %67 = tpu.reciprocal %66 {approx = true} : vector<8x1xf32> -> vector<8x1xf32>
      %c0_12 = arith.constant 0 : index
      %c0_13 = arith.constant 0 : index
      %68 = vector.load %arg6[%c0_12, %c0_13] : memref<8x128xf32, #tpu.memory_space<vmem>>, vector<8x128xf32>
      %69 = vector.broadcast %67 : vector<8x1xf32> to vector<8x128xf32>
      %70 = arith.mulf %68, %69 : vector<8x128xf32>
      %c0_14 = arith.constant 0 : index
      %c0_15 = arith.constant 0 : index
      %71 = vector.load %arg5[%c0_14, %c0_15] : memref<8x128xf32, #tpu.memory_space<vmem>>, vector<8x128xf32>
      tpu.vector_store %arg5[%c0_14, %c0_15], %70 {strides = array<i32>} : memref<8x128xf32, #tpu.memory_space<vmem>>, vector<8x128xf32>,
    } else {
    }
    return
  }
  func.func @transform_0(%arg0: i32, %arg1: i32) -> (i32, i32) {
    %c0_i32 = arith.constant 0 : i32
    %c0_i32_0 = arith.constant 0 : i32
    return %arg0, %c0_i32 : i32, i32
  }
  func.func @transform_1(%arg0: i32, %arg1: i32) -> (i32, i32) {
    %c0_i32 = arith.constant 0 : i32
    %c0_i32_0 = arith.constant 0 : i32
    return %arg0, %c0_i32 : i32, i32
  }
  func.func @transform_2(%arg0: i32, %arg1: i32) -> (i32, i32) {
    %c0_i32 = arith.constant 0 : i32
    %c0_i32_0 = arith.constant 0 : i32
    return %arg1, %c0_i32 : i32, i32
  }
  func.func @transform_3(%arg0: i32, %arg1: i32) -> (i32, i32) {
    %c0_i32 = arith.constant 0 : i32
    %c0_i32_0 = arith.constant 0 : i32
    return %arg0, %c0_i32 : i32, i32
  }
}

</mosaic_0001>

<bundles_post_ra>
// kernel: tpu_custom_call.1
= control target key start
LH: loop header
LB: loop body
LE: loop exit
PB: predicated region body
PF: predicated region fallthrough
CT: control target
= control target key end

     0   :  { %8 = vsyncpa [#allocation4], 0  ;;  %s1103_s0 = inlined_call_operand.vmem [shape: s32[16,8], index: 0, kind: input, shape index: {}]   ;;  %s1104_s1 = inlined_call_operand.vmem [shape: f32[16,1], index: 1, kind: input, shape index: {}]   ;;  %s1105_s2 = inlined_call_operand.hbm [shape: bf16[512,128], index: 2, kind: input, shape index: {}]   ;;  %s1106_s3 = inlined_call_operand.hbm [shape: f32[16,128], index: 3, kind: output, shape index: {}]  }
   0x1   :  { %10 = vsyncpa [#allocation4 + $0x1], 0 }
   0x2   :  { %11 = vsyncpa [#allocation5], 0 }
   0x3   :  { %13 = vsyncpa [#allocation5 + $0x1], 0  ;;  %s903_s12 = smov 0   ;;  %s905_s13 = smov 0  }
   0x4   :  { %s907_s14 = smov 0   ;;  %s909_s15 = smov 0  }
   0x5   :  { %s911_s16 = smov 0   ;;  %s913_s17 = smov 0  }
   0x6   :  { %s915_s18 = smov 0   ;;  %s917_s19 = smov 0  }
   0x7   :  { %s919_s20 = smov 0   ;;  %s921_s21 = smov 0  }
   0x8   :  { %s923_s22 = smov 0  }
   0x9 LB: > { %1111 = sst [smem:[#allocation9_spill]] %s860_s20  ;;  %s521_s23 = sadd.s32 4294967295, %s868_s22   ;;  %s868_s22 = sphi %s923_s22, %s19_s22   ;;  %s864_s21 = sphi %s921_s21, %s1122_s21   ;;  %s860_s20 = sphi %s919_s20, %s1121_s20   ;;  %s856_s19 = sphi %s917_s19, %s1120_s19   ;;  %s852_s18 = sphi %s915_s18, %s1119_s18   ;;  %s848_s17 = sphi %s913_s17, %s1128_s17   ;;  %s844_s16 = sphi %s911_s16, %s1127_s16   ;;  %s840_s15 = sphi %s909_s15, %s1126_s15   ;;  %s836_s14 = sphi %s907_s14, %s1125_s14   ;;  %s832_s13 = sphi %s905_s13, %s1124_s13   ;;  %s828_s12 = sphi %s903_s12, %s1123_s12  }
   0xa   : > { %1112 = sst [smem:[#allocation10_spill]] %s864_s21  ;;  %s522_s24 = sadd.s32 4294967294, %s868_s22  }
   0xb   : > { %s28_s25 = sadd.s32 1, %s860_s20  ;;  %s31_s26 = sadd.s32 1, %s864_s21 }
   0xc   : > { %p29_p0 = scmp.ge.s32.totalorder %s28_s25, 4  ;;  %s90_s27 = sadd.s32 1, %s848_s17 }
   0xd   : > { %p97_p1 = scmp.ne.s32.totalorder %s848_s17, %s844_s16  ;;  %p98_p2 = scmp.eq.s32.totalorder %s868_s22, 0 }
   0xe   : > { %s1130_s25 = smov (%p29_p0, %s28_s25), 0  ;;  %s1132_s26 = smov (!%p29_p0, %s31_s26), %s864_s21 }
   0xf   : > { %1113 = sst [smem:[#allocation11_spill]] %s1130_s25  ;;  %s87_s28 = ssub.s32 %s860_s20, %s1130_s25 }
  0x10   : > { %p969_p3 = por %p98_p2, %p97_p1  ;;  %p33_p4 = scmp.ge.s32.totalorder %s1132_s26, 2 }
  0x11   : > { %p88_p5 = scmp.eq.s32.totalorder %s87_s28, 0  ;;  %p103_p6 = scmp.ne.s32.totalorder %s844_s16, %s840_s15 }
  0x12   : > { %p104_p7 = scmp.eq.s32.totalorder %s521_s23, 0  ;;  %s1134_s26 = smov (%p33_p4, %s1132_s26), 0 }
  0x13   : > { %1115 = sst [smem:[#allocation12_spill]] %s1134_s26  ;;  %s113_s5 = ssub.s32 %s864_s21, %s1134_s26 }
  0x14   : > { %s977_s30 = scalar_select %p88_p5, %s848_s17, %s90_s27  }
  0x15   : > { %p979_p8 = por %p104_p7, %p103_p6  ;;  %p114_p9 = scmp.eq.s32.totalorder %s113_s5, 0 }
  0x16   : > { %s116_s6 = sadd.s32 1, %s836_s14  ;;  %p126_p10 = scmp.ne.s32.totalorder %s836_s14, %s832_s13 }
  0x17   : > { %p127_p11 = scmp.eq.s32.totalorder %s521_s23, 7  ;;  %p132_p13 = scmp.ne.s32.totalorder %s832_s13, %s828_s12 }
  0x18   : > { %s989_s7 = scalar_select %p114_p9, %s836_s14, %s116_s6  }
  0x19   : > { %p991_p12 = por %p127_p11, %p126_p10  ;;  %p133_p0 = scmp.eq.s32.totalorder %s522_s24, 7 }
  0x1a   : > { %p601_p1 = scmp.lt.s32.totalorder %s868_s22, 8  ;;  %s167_s9 = sand.u32 1, %s848_s17  }
  0x1b   : > { %p999_p2 = por %p133_p0, %p132_p13  ;;  %s525_s11 = sshll.u32 %s167_s9, 6 }
  0x1c   : > { %s580_s15 = sshll.u32 %s860_s20, 6  ;;  %s171_s6 = scalar_lea.vmem [#allocation3], %s525_s11 }
  0x1d   : > { %s176_s28 = scalar_lea.hbm %s1105_s2, %s580_s15  ;;  %s179_s26 = sshll.u32 %s171_s6, 4  ;;  %s180_s26 = int_to_ptr.vmem [resolvable:$true] %s179_s26 }
  0x1e   : > { %s177_s5 = sshll.u32 %s176_s28, 4  ;;  %p594_p4 = pnand %p601_p1, %p969_p3  ;;  %s178_s5 = int_to_ptr.hbm [resolvable:$true] %s177_s5 }
  0x1f   : > { %p528_p5 = scmp.ge.s32.totalorder %s868_s22, 1  ;;  %p187_p6 = scmp.lt.s32.totalorder %s868_s22, 9 }
  0x20   : > { %s168_s24 = scalar_lea.sflag [#allocation4], %s167_s9  ;;  %s870_s25 = smov 64  }
  0x21   : > { %s871_s21 = smov 4   ;;  %p188_p7 = pnand %p528_p5, %p187_p6 }
  0x22   : > { %596 = dma.hbm_to_vmem [thread:$0]  (!%p594_p4), %s178_s5, 1024, %s180_s26, %s168_s24, %s870_s25, %s870_s25, %s871_s21  }
  0x23   : > { %191 = sbr.rel (%p188_p7) target bundleno = 472 (0x1d8), region = 32  ;;  %s193_s20 = sand.u32 (!%p188_p7), 1, %s844_s16  }
  0x24   : > { %s529_s23 = sshll.u32 (!%p188_p7), %s193_s20, 6  ;;  %s194_s15 = scalar_lea.sflag (!%p188_p7), [#allocation4], %s193_s20 }
  0x25   : > { %s1012_s27 = scalar_lea.vmem (!%p188_p7), [#allocation3], %s529_s23 }
  0x28   : > { %819 = dma.done.wait (%p979_p8), %s194_s15, 1024  }
  0x29   : > { %821 = vsyncadd (%p979_p8), %s194_s15, 4294966272  ;;  %s226_s29 = sand.u32 1, %s832_s13   ;;  %p229_p3 = scmp.lt.s32.totalorder %s856_s19, 1 }
  0x2a   : > { %s1022_s21 = sshll.u32 %s226_s29, 3  ;;  %p533_p8 = scmp.ne.s32.totalorder %s852_s18, 0 }
  0x2b   : > { %s230_s25 = scalar_select %p229_p3, %s856_s19, 1 }
  0x2c   : > { %s228_s6 = scalar_lea.vmem [#allocation6], %s1022_s21  ;;  %241 = sbr.rel (%p533_p8) target bundleno = 51 (0x33), region = 40 }
  0x2d   : > { %s531_s26 = sshll.u32 %s230_s25, 3 }
  0x2e   : > { %s232_s11 = scalar_lea.vmem %s1103_s0, %s531_s26  ;;  %s1031_s4 = scalar_lea.vmem %s1104_s1, %s531_s26 }
  0x31   : > { %v872_v0 = vmov 0.0  }
  0x32   : > { %242 = vst [vmem:[#allocation2] sm:$0xff] %v872_v0 }
  0x33 PF: > { %v243_v1 = vld [vmem:[%s232_s11] sm:$0xff]  ;;  %s534_s24 = sshll.u32 %s852_s18, 7  ;;  %v873_v2 = vmov 0   ;;  %v874_v3 = vmov 2   ;;  %v875_v7 = vmov 4   ;;  %v876_v8 = vmov 1  }
  0x34   : > { %704 = vset.pattern.permute.xlu0 %v873_v2  ;;  %706 = vset.pattern.permute.xlu1 %v874_v3  ;;  %v245_v4 = vstv %s534_s24  ;;  %v588_v5 = vld [vmem:[%s1012_s27 + $0x38] sm:$0xff]  ;;  %v877_v9 = vmov 3   ;;  %v878_v10 = vmov 5   ;;  %v879_v11 = vmov 6   ;;  %v587_v13 = vld [vmem:[%s1012_s27 + $0x30] sm:$0xff]  ;;  %v586_v14 = vld [vmem:[%s1012_s27 + $0x28] sm:$0xff] }
  0x35   : > { %v246_v6 = vsub.s32 %v243_v1, %v245_v4  ;;  %708 = vset.pattern.permute.xlu2 %v875_v7  ;;  %371 = vmatpush.bf16.msra.mxu0 %v588_v5  ;;  %v880_v12 = vmov 7   ;;  %v585_v15 = vld [vmem:[%s1012_s27 + $0x20] sm:$0xff]  ;;  %v584_v16 = vld [vmem:[%s1012_s27 + $0x18] sm:$0xff]  ;;  %v583_v17 = vld [vmem:[%s1012_s27 + $0x10] sm:$0xff]  ;;  %v247_v21 = vlaneseq  ;;  %v881_v28 = vmov 0.0   ;;  %p575_p9 = scmp.ne.s32.totalorder %s852_s18, 3 }
  0x36   : > { %v582_v18 = vld [vmem:[%s1012_s27 + $0x8] sm:$0xff]  ;;  %v581_v19 = vld [vmem:[%s1012_s27] sm:$0xff] }
  0x37   : > { %250 = vperm.xlu0 %704, %v246_v6   ;;  %264 = vperm.xlu1 %706, %v246_v6   ;;  %v248_v24 = vand.u32 127, %v247_v21 }
  0x38   : > { %278 = vperm.xlu2 %708, %v246_v6  }
  0x39   : > { %372 = vmatpush.bf16.msra.mxu0 %v587_v13  ;;  %v305_v47 = vld [vmem:[#allocation2] sm:$0xff] }
  0x3d   : > { %373 = vmatpush.bf16.msra.mxu0 %v586_v14 }
  0x3f   : > { %705 = vset.pattern.permute.xlu0 %v876_v8  ;;  %707 = vset.pattern.permute.xlu1 %v877_v9 }
  0x40   : > { %257 = vperm.xlu0 %705, %v246_v6   ;;  %271 = vperm.xlu1 %707, %v246_v6  }
  0x41   : > { %709 = vset.pattern.permute.xlu2 %v878_v10  ;;  %374 = vmatpush.bf16.msra.mxu0 %v585_v15 }
  0x42   : > { %285 = vperm.xlu2 %709, %v246_v6  }
  0x45   : > { %375 = vmatpush.bf16.msra.mxu0 %v584_v16 }
  0x48   : > { %710 = vset.pattern.permute.xlu1 %v879_v11  ;;  %712 = vset.pattern.permute.xlu0 %v880_v12 }
  0x49   : > { %292 = vperm.xlu1 %710, %v246_v6   ;;  %376 = vmatpush.bf16.msra.mxu0 %v583_v17 }
  0x4a   : > { %711 = vset.pattern.permute.xlu2 %v880_v12 }
  0x4b   : > { %299 = vperm.xlu2 %711, %v246_v6  }
  0x4d   : > { %377 = vmatpush.bf16.msra.mxu0 %v582_v18 }
  0x51   : > { %378 = vmatpush.bf16.msra.mxu0 %v581_v19 }
  0x92   : > { %v279_v20 = vpop.permute.xlu2 %278 }
  0x93   : > { %vm280_vm4 = vcmp.eq.s32.totalorder %v279_v20, %v248_v24 }
  0x94   : > { %v539_v37 = vsel %vm280_vm4, 1.0, %v881_v28 }
  0x9c   : > { %v286_v25 = vpop.permute.xlu2 %285 }
  0x9d   : > { %vm287_vm5 = vcmp.eq.s32.totalorder %v286_v25, %v248_v24 }
  0x9e   : > { %v540_v40 = vsel %vm287_vm5, 1.0, %v881_v28 }
  0xa5   : > { %v300_v35 = vpop.permute.xlu2 %299 }
  0xa6   : > { %vm301_vm6 = vcmp.eq.s32.totalorder %v300_v35, %v248_v24 }
  0xa7   : > { %v542_v43 = vsel %vm301_vm6, 1.0, %v881_v28 }
  0xa9   : > { %v251_v22 = vpop.permute.xlu0 %250  ;;  %v265_v23 = vpop.permute.xlu1 %264 }
  0xaa   : > { %vm252_vm0 = vcmp.eq.s32.totalorder %v251_v22, %v248_v24  ;;  %vm266_vm1 = vcmp.eq.s32.totalorder %v265_v23, %v248_v24 }
  0xab   : > { %v535_v29 = vsel %vm252_vm0, 1.0, %v881_v28  ;;  %v537_v32 = vsel %vm266_vm1, 1.0, %v881_v28 }
  0xb2   : > { %v258_v26 = vpop.permute.xlu0 %257  ;;  %v272_v27 = vpop.permute.xlu1 %271 }
  0xb3   : > { %vm259_vm2 = vcmp.eq.s32.totalorder %v258_v26, %v248_v24  ;;  %vm273_vm3 = vcmp.eq.s32.totalorder %v272_v27, %v248_v24 }
  0xb4   : > { %v536_v30 = vsel %vm259_vm2, 1.0, %v881_v28  ;;  %v538_v34 = vsel %vm273_vm3, 1.0, %v881_v28 }
  0xb5   : > { %v262_v31 = vadd.f32 %v536_v30, %v535_v29 }
  0xb7   : > { %v269_v33 = vadd.f32 %v537_v32, %v262_v31 }
  0xb9   : > { %v276_v36 = vadd.f32 %v538_v34, %v269_v33 }
  0xbb   : > { %v283_v38 = vadd.f32 %v539_v37, %v276_v36  ;;  %v293_v39 = vpop.permute.xlu1 %292 }
  0xbc   : > { %vm294_vm7 = vcmp.eq.s32.totalorder %v293_v39, %v248_v24 }
  0xbd   : > { %v290_v41 = vadd.f32 %v540_v40, %v283_v38  ;;  %v541_v42 = vsel %vm294_vm7, 1.0, %v881_v28 }
  0xbf   : > { %v297_v44 = vadd.f32 %v541_v42, %v290_v41 }
  0xc1   : > { %v304_v45 = vadd.f32 %v542_v43, %v297_v44 }
  0xc3   : > { %v306_v46 = vpack.c.bf16 %v304_v45, %v304_v45 }
  0xc5   : > { %379 = vmatmul.bf16.vlgmr.msra.gmra.mxu0 %v306_v46 }
 0x142   : > { %v380_v48 = vpop.f32.mrf.mxu0 }
 0x143   : > { %v384_v49 = vadd.f32 %v380_v48, %v305_v47 }
 0x145   : > { %385 = vst [vmem:[#allocation2] sm:$0xff] %v384_v49 }
 0x146   : > { %389 = sbr.rel (%p575_p9) target bundleno = 457 (0x1c9), region = 44 }
 0x14a   : > { %v382_v50 = vpop.f32.mrf.mxu0 }
 0x14b   : > { %v390_v51 = vld [vmem:[%s1031_s4] sm:$0xff]  ;;  %v882_v52 = vmov 0  }
 0x14c   : > { %713 = vset.pattern.permute.xlu0 %v882_v52  ;;  %714 = vrcp.f32 %v390_v51  ;;  %v392_v54 = vld [vmem:[#allocation2] sm:$0xff] }
 0x152   : > { %v715_v53 = vpop.eup %714 }
 0x153   : > { %395 = vperm.xlu0 %713, %v715_v53  }
 0x1c5   : > { %v396_v55 = vpop.permute.xlu0 %395 }
 0x1c6   : > { %v398_v56 = vmul.f32 %v396_v55, %v392_v54 }
 0x1c8   : > { %399 = vst [vmem:[%s228_s6] sm:$0xff] %v398_v56 }
 0x1c9 PF: > { %s577_s18 = sshll.u32 %s856_s19, 3  ;;  %s413_s25 = sshll.u32 %s228_s6, 4  ;;  %s414_s25 = int_to_ptr.vmem [resolvable:$true] %s413_s25 }
 0x1ca   : > { %s411_s27 = scalar_lea.hbm %s1106_s3, %s577_s18  ;;  %s401_s20 = scalar_lea.sflag [#allocation5], %s226_s29 }
 0x1cb   : > { %s415_s26 = sshll.u32 %s411_s27, 4  ;;  %s766_s5 = scalar_lea.hbm %s1106_s3, 16  ;;  %s416_s26 = int_to_ptr.hbm [resolvable:$true] %s415_s26 }
 0x1cc   : > { %s760_s9 = sshra.s32 %s416_s26, 4  ;;  %s761_s9 = int_to_ptr.hbm [resolvable:$true] %s760_s9 }
 0x1cd   : > { %s762_s11 = scalar_lea.hbm %s761_s9, 8  ;;  %p767_p0 = scmp.lt.s32.totalorder %s761_s9, %s1106_s3 }
 0x1ce   : > { %p763_p10 = scmp.ne.s32.totalorder %s761_s9, %s762_s11  ;;  %p768_p1 = scmp.lt.s32.totalorder %s766_s5, %s762_s11 }
 0x1d0   : > { %p764_p11 = pnand %p763_p10, %p991_p12  ;;  %p769_p4 = por %p768_p1, %p767_p0 }
 0x1d2   : > { %p765_p13 = pneg %p764_p11 }
 0x1d4   : > { %p770_p5 = pnand %p769_p4, %p765_p13 }
 0x1d6   : > { %773 = shalt.err (!%p770_p5)
}
 0x1d7   : > { %591 = dma.vmem_to_hbm [thread:$0]  (%p991_p12), %s414_s25, 128, %s416_s26, %s401_s20  }
 0x1d8 PF: > { %p602_p6 = scmp.ge.s32.totalorder %s868_s22, 2  ;;  %s427_s29 = sand.u32 1, %s828_s12  }
 0x1d9   : > { %s428_s21 = scalar_lea.sflag [#allocation5], %s427_s29 }
 0x1da   : > { %p598_p7 = pnand %p602_p6, %p999_p2 }
 0x1dc   : > { %p599_p3 = pneg %p598_p7 }
 0x1de   : > { %823 = dma.done.wait (%p599_p3), %s428_s21, 128  }
 0x1df   : > { %825 = vsyncadd (%p599_p3), %s428_s21, 4294967168  ;;  %s19_s22 = sadd.s32 1, %s868_s22   ;;  %s1119_s18 = sld [smem:[#allocation9_spill]] }
 0x1e0   : > { %p16_p8 = scmp.ge.s32.totalorder %s19_s22, 10   ;;  %s1120_s19 = sld [smem:[#allocation10_spill]] }
 0x1e1   : > { %s1121_s20 = sld [smem:[#allocation11_spill]]  ;;  %s1123_s12 = smov %s832_s13 }
 0x1e2   : > { %s1122_s21 = sld [smem:[#allocation12_spill]]  ;;  %s1124_s13 = smov %s836_s14 }
 0x1e3   : > { %s1125_s14 = smov %s989_s7  ;;  %s1126_s15 = smov %s844_s16 }
 0x1e4   : > { %s1127_s16 = smov %s848_s17  ;;  %s1128_s17 = smov %s977_s30 }
 0x1e5   :  { %18 = sbr.rel (!%p16_p8) target bundleno = 9 (0x9), region = 91 }
 0x1ea   :  { %434 = vsyncpa [#allocation4], 1 }
 0x1eb   :  { %436 = vsyncpa [#allocation4 + $0x1], 1 }
 0x1ec   :  { %437 = vsyncpa [#allocation5], 1 }
 0x1ed   :  { %439 = vsyncpa [#allocation5 + $0x1], 1 }

</bundles_post_ra>
